<compile_context>
chip_gen: v7x
topology: tpu7x:2x2x1
jax: 0.10.0
libtpu: 0.0.40
codegen_flags: <defaults>
</compile_context>

<pallas_src>
import functools
import math

import jax
import jax.numpy as jnp
from jax.experimental import pallas as pl
from jax.experimental.pallas import tpu as pltpu

LANES = 128
ROW_TILE_MAX = 8192   # (8192, 128) f32 block = 4 MiB per input per grid step


def _round_up(x, m):
    return ((x + m - 1) // m) * m


def _cdiv(a, b):
    return -(-a // b)


def _sublane_pack(dtype):
    # Min second-minor tile: 8 for 4-byte, 16 for 2-byte, 32 for 1-byte dtypes.
    return max(8, 32 // jnp.dtype(dtype).itemsize)


def _focal_loss_kernel(x_ref, t_ref, o_ref, *, alpha, gamma, hard_targets,
                       row_tile, acc_rows):
    i = pl.program_id(1)

    @pl.when(i == 0)
    def _():
        o_ref[...] = jnp.zeros_like(o_ref)

    x = x_ref[...].astype(jnp.float32)
    t = t_ref[...].astype(jnp.float32)

    # Numerically-stable BCE with logits (same formula PyTorch uses):
    #   bce = max(x, 0) - x*t + log(1 + exp(-|x|))
    z = jnp.maximum(x, 0.0) - x * t
    e = jnp.exp(-jnp.abs(x))
    bce = z + jnp.log1p(e)

    if hard_targets:
        # For t in {0,1}: exp(-z) == e if z > 0 else 1, so
        #   pt = exp(-bce) = exp(-z) / (1 + e)
        # needs no second exp; the approx EUP reciprocal relieves the EUP slot.
        pt = jnp.where(z > 0.0, e, 1.0) * pl.reciprocal(1.0 + e, approx=True)
    else:
        pt = jnp.exp(-bce)

    om_pt = jnp.maximum(1.0 - pt, 0.0)

    # (1 - pt)^gamma: repeated multiplies for small integer gamma (the common
    # gamma=2 case) avoid the exp/log pow lowering on the EUP.
    g = float(gamma)
    if g == float(int(g)) and 0 <= int(g) <= 8:
        gi = int(g)
        if gi == 0:
            w = jnp.ones_like(om_pt)
        else:
            w = om_pt
            for _ in range(gi - 1):
                w = w * om_pt
    else:
        w = om_pt ** g

    focal = (alpha * w) * bce

    # Cheap VPU vreg adds into the resident (1, acc_rows, 128) output block;
    # the single cross-lane reduction happens outside the kernel (tiny array).
    partial = focal.reshape(row_tile // acc_rows, acc_rows, LANES).sum(axis=0)
    o_ref[...] += partial[None]


def focal_loss(inputs, targets, alpha=1.0, gamma=2.0, reduction="mean",
               hard_targets=False):
    """Focal loss with logits. reduction in ('mean', 'sum').

    Set hard_targets=True only when targets are exactly {0, 1}; it enables a
    cheaper pt computation (one fewer exp per element).
    """
    # TODO(synk): reduction='none' (elementwise output) not implemented in-kernel.
    assert reduction in ("mean", "sum"), "only 'mean'/'sum' implemented"
    assert inputs.shape == targets.shape
    assert inputs.size > 0

    n_elems = inputs.size
    rows = _cdiv(n_elems, LANES)
    sub = max(_sublane_pack(inputs.dtype), _sublane_pack(targets.dtype))

    if rows <= ROW_TILE_MAX:
        # Single block covering the (minimally padded) array; block == full
        # dims, so no sublane rounding is required.
        nb = 1
        row_tile = rows
    else:
        # Choose the block row count so that nb blocks tile the array exactly
        # (pad <= nb*sub rows ~ 0.1%), with blocks in [ROW_TILE_MAX/2,
        # ROW_TILE_MAX].  nb is forced even so the outer grid axis can split
        # 2-way without any extra padding.
        nb = _cdiv(rows, ROW_TILE_MAX)
        if nb % 2:
            nb += 1
        row_tile = _round_up(_cdiv(rows, nb), sub)

    rows_padded = nb * row_tile
    n_padded = rows_padded * LANES

    n_outer = 2 if (nb >= 2 and nb % 2 == 0) else 1
    n_inner = nb // n_outer

    # Accumulator width: widest divisor of row_tile up to 64 rows (more VALU
    # ILP than one (8,128) chain); tiny single blocks just use the whole block.
    acc_rows = 64 if row_tile % 64 == 0 else math.gcd(row_tile, 64)
    if acc_rows < 8:
        acc_rows = row_tile

    # Keep the native dtype (cast happens in-kernel).  Padding, when needed,
    # uses logit -1e4 / target 0 -> bce == 0 and pt == 1, so padded elements
    # contribute exactly 0 and no in-kernel mask is required.
    x_flat = inputs.reshape(-1)
    t_flat = targets.reshape(-1)
    pad = n_padded - n_elems
    if pad:
        # TODO(synk): zero-copy ragged-tail handling to avoid this pad copy.
        x_flat = jnp.pad(x_flat, (0, pad), constant_values=-1e4)
        t_flat = jnp.pad(t_flat, (0, pad), constant_values=0)
    x2d = x_flat.reshape(rows_padded, LANES)
    t2d = t_flat.reshape(rows_padded, LANES)

    kernel = functools.partial(
        _focal_loss_kernel,
        alpha=float(alpha),
        gamma=float(gamma),
        hard_targets=bool(hard_targets),
        row_tile=row_tile,
        acc_rows=acc_rows,
    )

    in_bytes = x2d.size * x2d.dtype.itemsize + t2d.size * t2d.dtype.itemsize
    out_elems = n_outer * acc_rows * LANES
    cost = pl.CostEstimate(
        flops=12 * n_padded,
        transcendentals=(2 if hard_targets else 3) * n_padded,
        bytes_accessed=in_bytes + out_elems * 4,
    )

    # Per-step VMEM: 2 inputs x 2 (double-buffered) + 2 output buffers.
    step_bytes = row_tile * LANES * (x2d.dtype.itemsize + t2d.dtype.itemsize)
    vmem_needed = 2 * step_bytes + 2 * acc_rows * LANES * 4
    vmem_limit = int(min(max(vmem_needed + (8 << 20), 32 << 20), 56 << 20))

    partials = pl.pallas_call(
        kernel,
        out_shape=jax.ShapeDtypeStruct((n_outer, acc_rows, LANES), jnp.float32),
        grid_spec=pltpu.PrefetchScalarGridSpec(
            num_scalar_prefetch=0,
            grid=(n_outer, n_inner),
            in_specs=[
                pl.BlockSpec((row_tile, LANES), lambda o, i: (o * n_inner + i, 0)),
                pl.BlockSpec((row_tile, LANES), lambda o, i: (o * n_inner + i, 0)),
            ],
            out_specs=pl.BlockSpec((1, acc_rows, LANES), lambda o, i: (o, 0, 0)),
        ),
        compiler_params=pltpu.CompilerParams(
            # Outer axis carries independent partial sums -> shardable.
            # TODO(synk): on v7x, verify the 2-TC split in a trace and switch
            # the outer axis to pltpu.CORE_PARALLEL if it is not taken.
            dimension_semantics=("parallel", "arbitrary"),
            vmem_limit_bytes=vmem_limit,
        ),
        cost_estimate=cost,
    )(x2d, t2d)

    total = jnp.sum(partials)
    if reduction == "mean":
        return total / jnp.float32(n_elems)
    return total


def _focal_loss_ref(inputs, targets, alpha=1.0, gamma=2.0, reduction="mean"):
    x = inputs.astype(jnp.float32)
    t = targets.astype(jnp.float32)
    bce = jnp.maximum(x, 0.0) - x * t + jnp.log1p(jnp.exp(-jnp.abs(x)))
    pt = jnp.exp(-bce)
    f = alpha * (1.0 - pt) ** gamma * bce
    return jnp.mean(f) if reduction == "mean" else jnp.sum(f)


if __name__ == "__main__":
    key = jax.random.PRNGKey(0)
    k_x, k_t, k_x2, k_t2 = jax.random.split(key, 4)

    # (B, C, H, W) = (2, 4, 16, 16), consistent with an NCHW logits map.
    shape = (2, 4, 16, 16)
    inputs = jax.random.normal(k_x, shape, dtype=jnp.float32)
    targets = jax.random.bernoulli(k_t, 0.5, shape).astype(jnp.float32)

    loss = focal_loss(inputs, targets, alpha=1.0, gamma=2.0, reduction="mean")
    loss = jax.block_until_ready(loss)
    ref = _focal_loss_ref(inputs, targets, alpha=1.0, gamma=2.0)
    assert jnp.allclose(loss, ref, rtol=1e-5, atol=1e-6), (loss, ref)

    # Non-lane-aligned size exercises the zero-contribution padding path.
    shape2 = (2, 3, 10, 10)
    inputs2 = jax.random.normal(k_x2, shape2, dtype=jnp.float32)
    targets2 = jax.random.bernoulli(k_t2, 0.5, shape2).astype(jnp.float32)
    loss2 = focal_loss(inputs2, targets2, alpha=0.25, gamma=2.0, reduction="sum")
    loss2 = jax.block_until_ready(loss2)
    ref2 = _focal_loss_ref(inputs2, targets2, alpha=0.25, gamma=2.0,
                           reduction="sum")
    assert jnp.allclose(loss2, ref2, rtol=1e-5, atol=1e-4), (loss2, ref2)

    # Hard-target fast path (one fewer exp/elem; approx EUP reciprocal).
    loss3 = focal_loss(inputs, targets, alpha=1.0, gamma=2.0, reduction="mean",
                       hard_targets=True)
    loss3 = jax.block_until_ready(loss3)
    assert jnp.allclose(loss3, ref, rtol=1e-2, atol=1e-3), (loss3, ref)

    print("KERNEL_OK")
</pallas_src>

<mosaic_0001>
module attributes {stable_mosaic.version = 11 : i64} {
  func.func @_focal_loss_kernel(%arg0: i32, %arg1: i32, %arg2: memref<16x128xf32, #tpu.memory_space<vmem>>, %arg3: memref<16x128xf32, #tpu.memory_space<vmem>>, %arg4: memref<1x16x128xf32, #tpu.memory_space<vmem>>) attributes {dimension_semantics = [#tpu.dimension_semantics<parallel>, #tpu.dimension_semantics<arbitrary>], iteration_bounds = array<i64: 1, 1>, scalar_prefetch = 0 : i64, scratch_operands = 0 : i64, tpu.core_type = #tpu.core_type<tc>, window_params = [{transform_indices = @transform_0, window_bounds = array<i64: 16, 128>}, {transform_indices = @transform_1, window_bounds = array<i64: 16, 128>}, {transform_indices = @transform_2, window_bounds = array<i64: 1, 16, 128>}]} {
    %c0_i32 = arith.constant 0 : i32
    %0 = arith.cmpi eq, %arg1, %c0_i32 : i32
    %1 = arith.extui %0 : i1 to i32
    %c0_i32_0 = arith.constant 0 : i32
    %2 = arith.cmpi ne, %1, %c0_i32_0 : i32
    scf.if %2 {
      %cst_16 = arith.constant 0.000000e+00 : f32
      %32 = vector.broadcast %cst_16 : f32 to vector<1x16x128xf32>
      %c0_17 = arith.constant 0 : index
      %c0_18 = arith.constant 0 : index
      %c0_19 = arith.constant 0 : index
      %33 = vector.load %arg4[%c0_17, %c0_18, %c0_19] : memref<1x16x128xf32, #tpu.memory_space<vmem>>, vector<1x16x128xf32>
      tpu.vector_store %arg4[%c0_17, %c0_18, %c0_19], %32 {strides = array<i32>} : memref<1x16x128xf32, #tpu.memory_space<vmem>>, vector<1x16x128xf32>,
    } else {
    }
    %c0 = arith.constant 0 : index
    %c0_1 = arith.constant 0 : index
    %3 = vector.load %arg2[%c0, %c0_1] : memref<16x128xf32, #tpu.memory_space<vmem>>, vector<16x128xf32>
    %c0_2 = arith.constant 0 : index
    %c0_3 = arith.constant 0 : index
    %4 = vector.load %arg3[%c0_2, %c0_3] : memref<16x128xf32, #tpu.memory_space<vmem>>, vector<16x128xf32>
    %cst = arith.constant 0.000000e+00 : f32
    %5 = vector.broadcast %cst : f32 to vector<16x128xf32>
    %6 = arith.maximumf %3, %5 : vector<16x128xf32>
    %7 = arith.mulf %3, %4 : vector<16x128xf32>
    %8 = arith.subf %6, %7 : vector<16x128xf32>
    %9 = math.absf %3 : vector<16x128xf32>
    %cst_4 = arith.constant 0.000000e+00 : f32
    %10 = vector.broadcast %cst_4 : f32 to vector<16x128xf32>
    %11 = arith.subf %10, %9 : vector<16x128xf32>
    %12 = math.exp %11 : vector<16x128xf32>
    %13 = math.log1p %12 : vector<16x128xf32>
    %14 = arith.addf %8, %13 : vector<16x128xf32>
    %cst_5 = arith.constant 0.000000e+00 : f32
    %15 = vector.broadcast %cst_5 : f32 to vector<16x128xf32>
    %16 = arith.subf %15, %14 : vector<16x128xf32>
    %17 = math.exp %16 : vector<16x128xf32>
    %cst_6 = arith.constant 1.000000e+00 : f32
    %18 = vector.broadcast %cst_6 : f32 to vector<16x128xf32>
    %19 = arith.subf %18, %17 : vector<16x128xf32>
    %cst_7 = arith.constant 0.000000e+00 : f32
    %20 = vector.broadcast %cst_7 : f32 to vector<16x128xf32>
    %21 = arith.maximumf %19, %20 : vector<16x128xf32>
    %22 = arith.mulf %21, %21 : vector<16x128xf32>
    %cst_8 = arith.constant 1.000000e+00 : f32
    %23 = vector.broadcast %cst_8 : f32 to vector<16x128xf32>
    %24 = arith.mulf %23, %22 : vector<16x128xf32>
    %25 = arith.mulf %24, %14 : vector<16x128xf32>
    %26 = vector.shape_cast %25 : vector<16x128xf32> to vector<1x16x128xf32>
    %cst_9 = arith.constant dense<0.000000e+00> : vector<16x128xf32>
    %27 = vector.multi_reduction <add>, %26, %cst_9 [0] : vector<1x16x128xf32> to vector<16x128xf32>
    %c0_10 = arith.constant 0 : index
    %c0_11 = arith.constant 0 : index
    %c0_12 = arith.constant 0 : index
    %28 = vector.load %arg4[%c0_10, %c0_11, %c0_12] : memref<1x16x128xf32, #tpu.memory_space<vmem>>, vector<1x16x128xf32>
    %29 = vector.shape_cast %27 : vector<16x128xf32> to vector<1x16x128xf32>
    %30 = arith.addf %28, %29 : vector<1x16x128xf32>
    %c0_13 = arith.constant 0 : index
    %c0_14 = arith.constant 0 : index
    %c0_15 = arith.constant 0 : index
    %31 = vector.load %arg4[%c0_13, %c0_14, %c0_15] : memref<1x16x128xf32, #tpu.memory_space<vmem>>, vector<1x16x128xf32>
    tpu.vector_store %arg4[%c0_13, %c0_14, %c0_15], %30 {strides = array<i32>} : memref<1x16x128xf32, #tpu.memory_space<vmem>>, vector<1x16x128xf32>,
    return
  }
  func.func @transform_0(%arg0: i32, %arg1: i32) -> (i32, i32) {
    %c1_i32 = arith.constant 1 : i32
    %0 = arith.muli %arg0, %c1_i32 : i32
    %1 = arith.addi %0, %arg1 : i32
    %c0_i32 = arith.constant 0 : i32
    %c0_i32_0 = arith.constant 0 : i32
    return %1, %c0_i32 : i32, i32
  }
  func.func @transform_1(%arg0: i32, %arg1: i32) -> (i32, i32) {
    %c1_i32 = arith.constant 1 : i32
    %0 = arith.muli %arg0, %c1_i32 : i32
    %1 = arith.addi %0, %arg1 : i32
    %c0_i32 = arith.constant 0 : i32
    %c0_i32_0 = arith.constant 0 : i32
    return %1, %c0_i32 : i32, i32
  }
  func.func @transform_2(%arg0: i32, %arg1: i32) -> (i32, i32, i32) {
    %c0_i32 = arith.constant 0 : i32
    %c0_i32_0 = arith.constant 0 : i32
    %c0_i32_1 = arith.constant 0 : i32
    return %arg0, %c0_i32, %c0_i32_0 : i32, i32, i32
  }
}

</mosaic_0001>

<bundles_post_ra>
// kernel: tpu_custom_call.1
= control target key start
LH: loop header
LB: loop body
LE: loop exit
PB: predicated region body
PF: predicated region fallthrough
CT: control target
= control target key end

     0   :  { %7 = vsyncpa [#allocation3], 0  ;;  %s291_s0 = inlined_call_operand.hbm [shape: f32[16,128], index: 0, kind: input, shape index: {}]   ;;  %s292_s1 = inlined_call_operand.hbm [shape: f32[16,128], index: 1, kind: input, shape index: {}]   ;;  %s293_s2 = inlined_call_operand.hbm [shape: f32[1,16,128], index: 2, kind: output, shape index: {}]  }
   0x1   :  { %8 = vsyncpa [#allocation6], 0 }
   0x2   :  { %9 = vsyncpa [#allocation4], 0  ;;  %s226_s9 = smov [#allocation2]   ;;  %s154_s13 = scalar_lea.hbm %s291_s0, 256 }
   0x3   :  { %s19_s10 = sshll.u32 %s226_s9, 4  ;;  %p155_p0 = scmp.ne.s32.totalorder %s291_s0, %s154_s13  ;;  %s20_s10 = int_to_ptr.vmem [resolvable:$true] %s19_s10 }
   0x4   :  { %p158_p1 = scmp.lt.u32.totalorder %s154_s13, %s291_s0 }
   0x6   :  { %p160_p2 = pnand %p158_p1, %p155_p0 }
   0x8   :  { %163 = shalt.err (!%p160_p2)
}
   0x9   :  { %s164_s18 = scalar_lea.vmem %s20_s10, 256  ;;  %p169_p4 = scmp.lt.s32.totalorder %s20_s10, %s20_s10 }
   0xa   :  { %p165_p3 = scmp.ne.s32.totalorder %s20_s10, %s164_s18  ;;  %p170_p5 = scmp.lt.s32.totalorder %s164_s18, %s164_s18 }
   0xc   :  { %p171_p6 = por %p170_p5, %p169_p4 }
   0xe   :  { %p172_p7 = pnand %p171_p6, %p165_p3 }
  0x10   :  { %175 = shalt.err (!%p172_p7)
}
  0x11   :  { %s227_s19 = smov 128   ;;  %s228_s20 = smov 8  }
  0x12   :  { %25 = dma.hbm_to_vmem [thread:$0]  %s291_s0, 256, %s20_s10, [#allocation3], %s227_s19, %s227_s19, %s228_s20  }
  0x13   :  { %s229_s23 = smov [#allocation5]   ;;  %s176_s27 = scalar_lea.hbm %s292_s1, 256 }
  0x14   :  { %s35_s24 = sshll.u32 %s229_s23, 4  ;;  %p177_p8 = scmp.ne.s32.totalorder %s292_s1, %s176_s27  ;;  %s36_s24 = int_to_ptr.vmem [resolvable:$true] %s35_s24 }
  0x15   :  { %p180_p9 = scmp.lt.u32.totalorder %s176_s27, %s292_s1 }
  0x17   :  { %p182_p10 = pnand %p180_p9, %p177_p8 }
  0x19   :  { %185 = shalt.err (!%p182_p10)
}
  0x1a   :  { %s186_s4 = scalar_lea.vmem %s36_s24, 256  ;;  %p191_p12 = scmp.lt.s32.totalorder %s36_s24, %s36_s24 }
  0x1b   :  { %p187_p11 = scmp.ne.s32.totalorder %s36_s24, %s186_s4  ;;  %p192_p13 = scmp.lt.s32.totalorder %s186_s4, %s186_s4 }
  0x1d   :  { %p193_p0 = por %p192_p13, %p191_p12 }
  0x1f   :  { %p194_p1 = pnand %p193_p0, %p187_p11 }
  0x21   :  { %197 = shalt.err (!%p194_p1)
}
  0x22   :  { %41 = dma.hbm_to_vmem [thread:$0]  %s292_s1, 256, %s36_s24, [#allocation6], %s227_s19, %s227_s19, %s228_s20  }
  0x23   :  { %220 = dma.done.wait [#allocation3], 256  }
  0x24   :  { %221 = vsyncadd [#allocation3], 4294967040 }
  0x25   :  { %222 = dma.done.wait [#allocation6], 256  }
  0x26   :  { %223 = vsyncadd [#allocation6], 4294967040  ;;  %v58_v0 = vld [vmem:[#allocation2] sm:$0xff]  ;;  %v59_v1 = vld [vmem:[#allocation2 + $0x8] sm:$0xff]  ;;  %s230_s1 = smov [#allocation7]  }
  0x27   :  { %v68_v2 = vand.u32 2147483647, %v58_v0  ;;  %v69_v3 = vand.u32 2147483647, %v59_v1  ;;  %v60_v14 = vld [vmem:[#allocation5] sm:$0xff]  ;;  %v61_v15 = vld [vmem:[#allocation5 + $0x8] sm:$0xff] }
  0x28   :  { %v62_v17 = vmax.f32 %v58_v0, 0.0  ;;  %v64_v18 = vmul.f32 %v60_v14, %v58_v0  ;;  %v63_v21 = vmax.f32 %v59_v1, 0.0  ;;  %v65_v22 = vmul.f32 %v61_v15, %v59_v1  ;;  %s123_s6 = sshll.u32 %s230_s1, 4  ;;  %s124_s6 = int_to_ptr.vmem [resolvable:$true] %s123_s6 }
  0x29   :  { %v70_v4 = vsub.f32 0.0, %v68_v2  ;;  %v71_v5 = vsub.f32 0.0, %v69_v3  ;;  %s198_s7 = scalar_lea.vmem %s124_s6, 256  ;;  %p203_p3 = scmp.lt.s32.totalorder %s124_s6, %s124_s6 }
  0x2a   :  { %v66_v26 = vsub.f32 %v62_v17, %v64_v18  ;;  %v67_v30 = vsub.f32 %v63_v21, %v65_v22  ;;  %p199_p2 = scmp.ne.s32.totalorder %s124_s6, %s198_s7  ;;  %p204_p4 = scmp.lt.s32.totalorder %s198_s7, %s198_s7 }
  0x2b   :  { %v72_v6 = vmul.f32 1.442695, %v70_v4  ;;  %v74_v7 = vmul.f32 1.442695, %v71_v5 }
  0x2c   :  { %p205_p5 = por %p204_p4, %p203_p3 }
  0x2d   :  { %142 = vpow2.f32 %v72_v6 }
  0x2e   :  { %144 = vpow2.f32 %v74_v7  ;;  %p206_p6 = pnand %p205_p5, %p199_p2 }
  0x37   :  { %v143_v8 = vpop.eup %142 }
  0x38   :  { %v145_v9 = vpop.eup %144  ;;  %v76_v10 = vadd.f32 1.0, %v143_v8  ;;  %v79_v12 = vmul.f32 -0.5, %v143_v8  ;;  %v82_v19 = vand.u32 2147483647, %v143_v8 }
  0x39   :  { %v85_v11 = vadd.f32 1.0, %v145_v9  ;;  %v88_v13 = vmul.f32 -0.5, %v145_v9  ;;  %v91_v23 = vand.u32 2147483647, %v145_v9 }
  0x3a   :  { %146 = vlog2.f32 %v76_v10  ;;  %v80_v16 = vadd.f32 1.0, %v79_v12  ;;  %vm83_vm0 = vcmp.lt.f32.partialorder %v82_v19, 0.0004427343 }
  0x3b   :  { %148 = vlog2.f32 %v85_v11  ;;  %v89_v20 = vadd.f32 1.0, %v88_v13  ;;  %vm92_vm1 = vcmp.lt.f32.partialorder %v91_v23, 0.0004427343 }
  0x3c   :  { %v81_v24 = vmul.f32 %v143_v8, %v80_v16 }
  0x3d   :  { %v90_v27 = vmul.f32 %v145_v9, %v89_v20 }
  0x44   :  { %v147_v25 = vpop.eup %146 }
  0x45   :  { %v149_v28 = vpop.eup %148  ;;  %v78_v29 = vmul.f32 0.6931472, %v147_v25 }
  0x46   :  { %v87_v31 = vmul.f32 0.6931472, %v149_v28 }
  0x47   :  { %v84_v32 = vsel %vm83_vm0, %v81_v24, %v78_v29 }
  0x48   :  { %v94_v33 = vadd.f32 %v84_v32, %v66_v26  ;;  %v93_v34 = vsel %vm92_vm1, %v90_v27, %v87_v31 }
  0x49   :  { %v95_v35 = vadd.f32 %v93_v34, %v67_v30 }
  0x4a   :  { %v96_v36 = vsub.f32 0.0, %v94_v33 }
  0x4b   :  { %v97_v37 = vsub.f32 0.0, %v95_v35 }
  0x4c   :  { %v98_v38 = vmul.f32 1.442695, %v96_v36 }
  0x4d   :  { %v100_v39 = vmul.f32 1.442695, %v97_v37 }
  0x4e   :  { %150 = vpow2.f32 %v98_v38 }
  0x4f   :  { %152 = vpow2.f32 %v100_v39 }
  0x58   :  { %v151_v40 = vpop.eup %150 }
  0x59   :  { %v153_v41 = vpop.eup %152  ;;  %v102_v42 = vsub.f32 1.0, %v151_v40 }
  0x5a   :  { %v103_v43 = vsub.f32 1.0, %v153_v41 }
  0x5b   :  { %v104_v44 = vmax.f32 %v102_v42, 0.0 }
  0x5c   :  { %v105_v45 = vmax.f32 %v103_v43, 0.0 }
  0x5d   :  { %v106_v46 = vmul.f32 %v104_v44, %v104_v44 }
  0x5e   :  { %v107_v47 = vmul.f32 %v105_v45, %v105_v45 }
  0x5f   :  { %v108_v48 = vmul.f32 %v106_v46, %v94_v33 }
  0x60   :  { %v109_v49 = vmul.f32 %v107_v47, %v95_v35 }
  0x61   :  { %116 = vst [vmem:[#allocation7] sm:$0xff] %v108_v48 }
  0x62   :  { %117 = vst [vmem:[#allocation7 + $0x8] sm:$0xff] %v109_v49 }
  0x63   :  { %209 = shalt.err (!%p206_p6)
}
  0x64   :  { %s210_s10 = scalar_lea.hbm %s293_s2, 256 }
  0x65   :  { %p211_p7 = scmp.ne.s32.totalorder %s293_s2, %s210_s10  ;;  %p214_p8 = scmp.lt.u32.totalorder %s210_s10, %s293_s2 }
  0x67   :  { %p216_p9 = pnand %p214_p8, %p211_p7 }
  0x69   :  { %219 = shalt.err (!%p216_p9)
}
  0x6a   :  { %129 = dma.vmem_to_hbm [thread:$0]  %s124_s6, 256, %s293_s2, [#allocation4], %s227_s19, %s227_s19, %s228_s20  }
  0x6b   :  { %224 = dma.done.wait [#allocation4], 256  }
  0x6c   :  { %225 = vsyncadd [#allocation4], 4294967040 }
  0x6d   :  { %133 = vsyncpa [#allocation3], 1 }
  0x6e   :  { %134 = vsyncpa [#allocation6], 1 }
  0x6f   :  { %135 = vsyncpa [#allocation4], 1 }

</bundles_post_ra>
